<compile_context>
chip_gen: v6e
topology: v6e:2x2x1
jax: 0.10.0
libtpu: 0.0.40
codegen_flags: <defaults>
</compile_context>

<pallas_src>
import jax
import jax.numpy as jnp
from jax.experimental import pallas as pl
from jax.experimental.pallas import tpu as pltpu

_PAD = 128              # padded hidden width (one full lane group)
_N_LAYERS = 4
_OUT_DIM = 3            # [phi_0, phi_1, 1.0]
_MAX_BLOCK_ROWS = 4096  # max batch tile for the 1-D batch grid


def _round_up(n, m):
    return -(-n // m) * m


def _detect_v7x():
    try:
        return "v7" in jax.devices()[0].device_kind.lower()
    except Exception:
        return False


_IS_V7X = _detect_v7x()


# -----------------------------------------------------------------------------
# Kernel
# -----------------------------------------------------------------------------
def _phi_net_kernel(x_ref, w1_ref, wr_ref, b_ref, o_ref):
    """One batch tile of the full forward pass (weights resident in VMEM).

    x_ref : (TB, in_pad)      f32, zero-padded input rows
    w1_ref: (in_pad, 128)     bf16, zero-padded layer-1 weight
    wr_ref: (3, 128, 128)     bf16, zero-padded weights for layers 2..4
    b_ref : (4, 1, 128)       f32, zero-padded biases; layer-4 lane 2 holds 1.0
    o_ref : (TB, 128)         f32, lane-dense output (lanes 0:3 are real)
    """
    # Layer 1: narrow-K dot against the separately packed W1.
    h = jnp.dot(x_ref[...].astype(jnp.bfloat16), w1_ref[...],
                preferred_element_type=jnp.float32) + b_ref[0]
    h = jnp.maximum(h, 0.0)
    # Layers 2..4 against the (128,128) resident tiles.
    for i in range(_N_LAYERS - 1):
        h = jnp.dot(h.astype(jnp.bfloat16), wr_ref[i],
                    preferred_element_type=jnp.float32) + b_ref[i + 1]
        if i < _N_LAYERS - 2:
            h = jnp.maximum(h, 0.0)
    # Ones column already folded into the layer-4 bias (lane 2 = 1.0).
    # Full-width lane-dense store; padded lanes hold zeros.
    o_ref[...] = h.astype(o_ref.dtype)


# -----------------------------------------------------------------------------
# Parameter construction / packing
# -----------------------------------------------------------------------------
def init_phi_net_params(key, input_dim):
    """Deterministic init matching the PyTorch layer shapes.

    Weights are stored (in, out) (transposed vs. torch) so the kernel does
    x @ W directly; biases are (out,).
    """
    dims = [(input_dim, 50), (50, 60), (60, 50), (50, 2)]
    params = []
    for i, (din, dout) in enumerate(dims):
        kw, kb = jax.random.split(jax.random.fold_in(key, i))
        bound = 1.0 / jnp.sqrt(jnp.float32(din))  # torch Linear default range
        w = jax.random.uniform(kw, (din, dout), jnp.float32, -bound, bound)
        b = jax.random.uniform(kb, (dout,), jnp.float32, -bound, bound)
        params.append((w, b))
    return params


def pack_phi_net_params(params, input_dim):
    """Pack parameters for the kernel.

    Returns:
      w1_packed: (in_pad, 128) bf16   layer-1 weight, in_pad = round_up(in,8)
      wr_packed: (3, 128, 128) bf16   layers 2..4
      b_packed : (4, 1, 128)   f32    biases; layer-4 lane 2 = 1.0 (ones col)
    """
    assert len(params) == _N_LAYERS
    in_pad = _round_up(max(input_dim, 1), 8)

    w1, b1 = params[0]
    assert w1.shape[0] == input_dim and w1.shape[1] <= _PAD
    w1_packed = jnp.zeros((in_pad, _PAD), jnp.bfloat16)
    w1_packed = w1_packed.at[:w1.shape[0], :w1.shape[1]].set(
        w1.astype(jnp.bfloat16))

    wr_packed = jnp.zeros((_N_LAYERS - 1, _PAD, _PAD), jnp.bfloat16)
    b_packed = jnp.zeros((_N_LAYERS, 1, _PAD), jnp.float32)
    b_packed = b_packed.at[0, 0, :b1.shape[0]].set(b1.astype(jnp.float32))
    for i in range(1, _N_LAYERS):
        w, b = params[i]
        assert w.shape[0] <= _PAD and w.shape[1] <= _PAD
        wr_packed = wr_packed.at[i - 1, :w.shape[0], :w.shape[1]].set(
            w.astype(jnp.bfloat16))
        b_packed = b_packed.at[i, 0, :b.shape[0]].set(b.astype(jnp.float32))

    # Fold the appended constant "1" feature: W4 column 2 is already zero,
    # so bias lane 2 = 1.0 makes output lane 2 exactly 1.0.
    b_packed = b_packed.at[_N_LAYERS - 1, 0, 2].set(1.0)
    return w1_packed, wr_packed, b_packed


# -----------------------------------------------------------------------------
# Forward wrapper
# -----------------------------------------------------------------------------
@jax.jit
def _phi_net_forward_2d(x, w1_packed, wr_packed, b_packed):
    B, in_dim = x.shape
    in_pad = w1_packed.shape[0]
    assert in_dim <= in_pad, "input_dim larger than packed W1"

    # ---- adaptive batch tiling -------------------------------------------
    if B <= _MAX_BLOCK_ROWS:
        n_tiles = 1
        tb = _round_up(B, 8)
    else:
        n_tiles = pl.cdiv(B, _MAX_BLOCK_ROWS)
        if _IS_V7X and (n_tiles % 2):
            n_tiles += 1          # even tile count -> both TensorCores busy
        tb = _round_up(pl.cdiv(B, n_tiles), 8)
    b_pad = tb * n_tiles

    # Only pad the batch to the tile multiple and features to a sublane
    # multiple (NOT to 128): keeps input HBM traffic minimal.
    xp = jnp.pad(x.astype(jnp.float32),
                 ((0, b_pad - B), (0, in_pad - in_dim)))

    if _IS_V7X and n_tiles > 1:
        semantics = (pltpu.CORE_PARALLEL,)   # shard batch tiles across 2 TCs
    else:
        semantics = (pltpu.PARALLEL,)

    # Advisory cost hint for XLA's scheduler around the custom call.
    flops = 2 * b_pad * (in_pad * _PAD + (_N_LAYERS - 1) * _PAD * _PAD)
    bytes_accessed = (b_pad * in_pad * 4              # x read
                      + b_pad * _PAD * 4              # lane-dense out write
                      + w1_packed.size * 2 + wr_packed.size * 2
                      + b_packed.size * 4)

    out = pl.pallas_call(
        _phi_net_kernel,
        out_shape=jax.ShapeDtypeStruct((b_pad, _PAD), jnp.float32),
        grid=(n_tiles,),
        in_specs=[
            # batch tile of x: pipelined across the grid (narrow feature dim)
            pl.BlockSpec((tb, in_pad), lambda i: (i, 0)),
            # packed weights / biases: constant index -> DMA'd once, resident
            pl.BlockSpec((in_pad, _PAD), lambda i: (0, 0)),
            pl.BlockSpec((_N_LAYERS - 1, _PAD, _PAD), lambda i: (0, 0, 0)),
            pl.BlockSpec((_N_LAYERS, 1, _PAD), lambda i: (0, 0, 0)),
        ],
        # Lane-dense output slab: unmasked full-width stores.
        out_specs=pl.BlockSpec((tb, _PAD), lambda i: (i, 0)),
        compiler_params=pltpu.CompilerParams(dimension_semantics=semantics),
        cost_estimate=pl.CostEstimate(flops=flops, transcendentals=0,
                                      bytes_accessed=bytes_accessed),
    )(xp, w1_packed, wr_packed, b_packed)

    # Slice the real rows / lanes in the wrapper (padded lanes never leak).
    return out[:B, :_OUT_DIM]


def phi_net_forward(x, w1_packed, wr_packed, b_packed):
    """x: (B, input_dim) or (input_dim,) float32 -> (B, 3) or (3,)."""
    squeeze = x.ndim == 1
    if squeeze:
        x = x[None, :]
    out = _phi_net_forward_2d(x, w1_packed, wr_packed, b_packed)
    if squeeze:
        out = out[0]
    return out


# -----------------------------------------------------------------------------
# Pure-JAX reference (for correctness check, f32 weights)
# -----------------------------------------------------------------------------
def _reference_forward(x, params):
    h = x
    for i, (w, b) in enumerate(params):
        h = h @ w + b
        if i < _N_LAYERS - 1:
            h = jnp.maximum(h, 0.0)
    ones_shape = (1,) if x.ndim == 1 else (x.shape[0], 1)
    return jnp.concatenate([h, jnp.ones(ones_shape, h.dtype)], axis=-1)


# -----------------------------------------------------------------------------
# Demo / self-test
# -----------------------------------------------------------------------------
if __name__ == "__main__":
    key = jax.random.PRNGKey(0)
    input_dim = 12   # typical quadrotor feature dimension

    k_param, k_x1, k_x2, k_x3 = jax.random.split(key, 4)
    params = init_phi_net_params(k_param, input_dim)
    w1_p, wr_p, b_p = pack_phi_net_params(params, input_dim)

    # bf16 MXU inputs (f32 accumulation) -> ~1e-3-level relative error vs the
    # pure-f32 reference is expected; outputs here are O(0.05), so this
    # tolerance has large margin while still catching real bugs.
    ATOL = RTOL = 1e-2

    # --- small batch (single grid point) -------------------------------------
    batch = 8
    x_small = jax.random.normal(k_x1, (batch, input_dim), jnp.float32)
    out_small = jax.block_until_ready(phi_net_forward(x_small, w1_p, wr_p, b_p))
    ref_small = _reference_forward(x_small, params)
    assert out_small.shape == (batch, 3), out_small.shape
    assert jnp.allclose(out_small, ref_small, atol=ATOL, rtol=RTOL), \
        "mismatch vs reference (small batch)"
    assert jnp.allclose(out_small[:, -1], 1.0), "ones column wrong (small batch)"

    # --- medium batch (single large tile) ------------------------------------
    med_batch = 1000
    x_med = jax.random.normal(k_x2, (med_batch, input_dim), jnp.float32)
    out_med = jax.block_until_ready(phi_net_forward(x_med, w1_p, wr_p, b_p))
    ref_med = _reference_forward(x_med, params)
    assert out_med.shape == (med_batch, 3), out_med.shape
    assert jnp.allclose(out_med, ref_med, atol=ATOL, rtol=RTOL), \
        "mismatch vs reference (medium batch)"
    assert jnp.allclose(out_med[:, -1], 1.0), "ones column wrong (medium batch)"

    # --- large batch (multi-tile grid, pipelined / core-parallel path) -------
    big_batch = 5000
    x_big = jax.random.normal(k_x3, (big_batch, input_dim), jnp.float32)
    out_big = jax.block_until_ready(phi_net_forward(x_big, w1_p, wr_p, b_p))
    ref_big = _reference_forward(x_big, params)
    assert out_big.shape == (big_batch, 3), out_big.shape
    assert jnp.allclose(out_big, ref_big, atol=ATOL, rtol=RTOL), \
        "mismatch vs reference (large batch)"
    assert jnp.allclose(out_big[:, -1], 1.0), "ones column wrong (large batch)"

    # --- 1-D input path (torch semantics: returns shape (3,)) ----------------
    x_vec = x_small[0]
    out_vec = jax.block_until_ready(phi_net_forward(x_vec, w1_p, wr_p, b_p))
    ref_vec = _reference_forward(x_vec, params)
    assert out_vec.shape == (3,), out_vec.shape
    assert jnp.allclose(out_vec, ref_vec, atol=ATOL, rtol=RTOL), \
        "mismatch vs reference (1-D input)"

    print("KERNEL_OK")
</pallas_src>

<mosaic_0001>
module attributes {stable_mosaic.version = 11 : i64} {
  func.func @_phi_net_kernel(%arg0: i32, %arg1: memref<8x16xf32, #tpu.memory_space<vmem>>, %arg2: memref<16x128xbf16, #tpu.memory_space<vmem>>, %arg3: memref<3x128x128xbf16, #tpu.memory_space<vmem>>, %arg4: memref<4x1x128xf32, #tpu.memory_space<vmem>>, %arg5: memref<8x128xf32, #tpu.memory_space<vmem>>) attributes {dimension_semantics = [#tpu.dimension_semantics<parallel>], iteration_bounds = array<i64: 1>, scalar_prefetch = 0 : i64, scratch_operands = 0 : i64, tpu.core_type = #tpu.core_type<tc>, window_params = [{transform_indices = @transform_0, window_bounds = array<i64: 8, 16>}, {pipeline_mode = #tpu.pipeline_mode<synchronous>, transform_indices = @transform_1, window_bounds = array<i64: 16, 128>}, {pipeline_mode = #tpu.pipeline_mode<synchronous>, transform_indices = @transform_2, window_bounds = array<i64: 3, 128, 128>}, {pipeline_mode = #tpu.pipeline_mode<synchronous>, transform_indices = @transform_3, window_bounds = array<i64: 4, 1, 128>}, {transform_indices = @transform_4, window_bounds = array<i64: 8, 128>}]} {
    %c0 = arith.constant 0 : index
    %c0_0 = arith.constant 0 : index
    %0 = vector.load %arg1[%c0, %c0_0] : memref<8x16xf32, #tpu.memory_space<vmem>>, vector<8x16xf32>
    %1 = arith.truncf %0 : vector<8x16xf32> to vector<8x16xbf16>
    %c0_1 = arith.constant 0 : index
    %c0_2 = arith.constant 0 : index
    %2 = vector.load %arg2[%c0_1, %c0_2] : memref<16x128xbf16, #tpu.memory_space<vmem>>, vector<16x128xbf16>
    %cst = arith.constant dense<0.000000e+00> : vector<8x128xf32>
    %3 = tpu.matmul %1, %2, %cst {dimension_numbers = #tpu.dot_dimension_numbers<[1], [0], [0], [1], [0, 0, 1, 1], [], []>} : vector<8x16xbf16>, vector<16x128xbf16>, vector<8x128xf32> -> vector<8x128xf32>
    %c0_3 = arith.constant 0 : index
    %c0_4 = arith.constant 0 : index
    %c0_5 = arith.constant 0 : index
    %4 = vector.load %arg4[%c0_3, %c0_4, %c0_5] : memref<4x1x128xf32, #tpu.memory_space<vmem>>, vector<1x1x128xf32>
    %5 = vector.shape_cast %4 : vector<1x1x128xf32> to vector<1x128xf32>
    %6 = vector.broadcast %5 : vector<1x128xf32> to vector<8x128xf32>
    %7 = arith.addf %3, %6 : vector<8x128xf32>
    %cst_6 = arith.constant 0.000000e+00 : f32
    %8 = vector.broadcast %cst_6 : f32 to vector<8x128xf32>
    %9 = arith.maximumf %7, %8 : vector<8x128xf32>
    %10 = arith.truncf %9 : vector<8x128xf32> to vector<8x128xbf16>
    %c0_7 = arith.constant 0 : index
    %c0_8 = arith.constant 0 : index
    %c0_9 = arith.constant 0 : index
    %11 = vector.load %arg3[%c0_7, %c0_8, %c0_9] : memref<3x128x128xbf16, #tpu.memory_space<vmem>>, vector<1x128x128xbf16>
    %12 = vector.shape_cast %11 : vector<1x128x128xbf16> to vector<128x128xbf16>
    %cst_10 = arith.constant dense<0.000000e+00> : vector<8x128xf32>
    %13 = tpu.matmul %10, %12, %cst_10 {dimension_numbers = #tpu.dot_dimension_numbers<[1], [0], [0], [1], [0, 0, 1, 1], [], []>} : vector<8x128xbf16>, vector<128x128xbf16>, vector<8x128xf32> -> vector<8x128xf32>
    %c1 = arith.constant 1 : index
    %c0_11 = arith.constant 0 : index
    %c0_12 = arith.constant 0 : index
    %14 = vector.load %arg4[%c1, %c0_11, %c0_12] : memref<4x1x128xf32, #tpu.memory_space<vmem>>, vector<1x1x128xf32>
    %15 = vector.shape_cast %14 : vector<1x1x128xf32> to vector<1x128xf32>
    %16 = vector.broadcast %15 : vector<1x128xf32> to vector<8x128xf32>
    %17 = arith.addf %13, %16 : vector<8x128xf32>
    %cst_13 = arith.constant 0.000000e+00 : f32
    %18 = vector.broadcast %cst_13 : f32 to vector<8x128xf32>
    %19 = arith.maximumf %17, %18 : vector<8x128xf32>
    %20 = arith.truncf %19 : vector<8x128xf32> to vector<8x128xbf16>
    %c1_14 = arith.constant 1 : index
    %c0_15 = arith.constant 0 : index
    %c0_16 = arith.constant 0 : index
    %21 = vector.load %arg3[%c1_14, %c0_15, %c0_16] : memref<3x128x128xbf16, #tpu.memory_space<vmem>>, vector<1x128x128xbf16>
    %22 = vector.shape_cast %21 : vector<1x128x128xbf16> to vector<128x128xbf16>
    %cst_17 = arith.constant dense<0.000000e+00> : vector<8x128xf32>
    %23 = tpu.matmul %20, %22, %cst_17 {dimension_numbers = #tpu.dot_dimension_numbers<[1], [0], [0], [1], [0, 0, 1, 1], [], []>} : vector<8x128xbf16>, vector<128x128xbf16>, vector<8x128xf32> -> vector<8x128xf32>
    %c2 = arith.constant 2 : index
    %c0_18 = arith.constant 0 : index
    %c0_19 = arith.constant 0 : index
    %24 = vector.load %arg4[%c2, %c0_18, %c0_19] : memref<4x1x128xf32, #tpu.memory_space<vmem>>, vector<1x1x128xf32>
    %25 = vector.shape_cast %24 : vector<1x1x128xf32> to vector<1x128xf32>
    %26 = vector.broadcast %25 : vector<1x128xf32> to vector<8x128xf32>
    %27 = arith.addf %23, %26 : vector<8x128xf32>
    %cst_20 = arith.constant 0.000000e+00 : f32
    %28 = vector.broadcast %cst_20 : f32 to vector<8x128xf32>
    %29 = arith.maximumf %27, %28 : vector<8x128xf32>
    %30 = arith.truncf %29 : vector<8x128xf32> to vector<8x128xbf16>
    %c2_21 = arith.constant 2 : index
    %c0_22 = arith.constant 0 : index
    %c0_23 = arith.constant 0 : index
    %31 = vector.load %arg3[%c2_21, %c0_22, %c0_23] : memref<3x128x128xbf16, #tpu.memory_space<vmem>>, vector<1x128x128xbf16>
    %32 = vector.shape_cast %31 : vector<1x128x128xbf16> to vector<128x128xbf16>
    %cst_24 = arith.constant dense<0.000000e+00> : vector<8x128xf32>
    %33 = tpu.matmul %30, %32, %cst_24 {dimension_numbers = #tpu.dot_dimension_numbers<[1], [0], [0], [1], [0, 0, 1, 1], [], []>} : vector<8x128xbf16>, vector<128x128xbf16>, vector<8x128xf32> -> vector<8x128xf32>
    %c3 = arith.constant 3 : index
    %c0_25 = arith.constant 0 : index
    %c0_26 = arith.constant 0 : index
    %34 = vector.load %arg4[%c3, %c0_25, %c0_26] : memref<4x1x128xf32, #tpu.memory_space<vmem>>, vector<1x1x128xf32>
    %35 = vector.shape_cast %34 : vector<1x1x128xf32> to vector<1x128xf32>
    %36 = vector.broadcast %35 : vector<1x128xf32> to vector<8x128xf32>
    %37 = arith.addf %33, %36 : vector<8x128xf32>
    %c0_27 = arith.constant 0 : index
    %c0_28 = arith.constant 0 : index
    %38 = vector.load %arg5[%c0_27, %c0_28] : memref<8x128xf32, #tpu.memory_space<vmem>>, vector<8x128xf32>
    tpu.vector_store %arg5[%c0_27, %c0_28], %37 {strides = array<i32>} : memref<8x128xf32, #tpu.memory_space<vmem>>, vector<8x128xf32>,
    return
  }
  func.func @transform_0(%arg0: i32) -> (i32, i32) {
    %c0_i32 = arith.constant 0 : i32
    %c0_i32_0 = arith.constant 0 : i32
    return %arg0, %c0_i32 : i32, i32
  }
  func.func @transform_1(%arg0: i32) -> (i32, i32) {
    %c0_i32 = arith.constant 0 : i32
    %c0_i32_0 = arith.constant 0 : i32
    %c0_i32_1 = arith.constant 0 : i32
    return %c0_i32, %c0_i32_0 : i32, i32
  }
  func.func @transform_2(%arg0: i32) -> (i32, i32, i32) {
    %c0_i32 = arith.constant 0 : i32
    %c0_i32_0 = arith.constant 0 : i32
    %c0_i32_1 = arith.constant 0 : i32
    %c0_i32_2 = arith.constant 0 : i32
    return %c0_i32, %c0_i32_0, %c0_i32_1 : i32, i32, i32
  }
  func.func @transform_3(%arg0: i32) -> (i32, i32, i32) {
    %c0_i32 = arith.constant 0 : i32
    %c0_i32_0 = arith.constant 0 : i32
    %c0_i32_1 = arith.constant 0 : i32
    %c0_i32_2 = arith.constant 0 : i32
    return %c0_i32, %c0_i32_0, %c0_i32_1 : i32, i32, i32
  }
  func.func @transform_4(%arg0: i32) -> (i32, i32) {
    %c0_i32 = arith.constant 0 : i32
    %c0_i32_0 = arith.constant 0 : i32
    return %arg0, %c0_i32 : i32, i32
  }
}

</mosaic_0001>

<bundles_post_ra>
// kernel: _phi_net_forward_2d.1
= control target key start
LH: loop header
LB: loop body
LE: loop exit
PB: predicated region body
PF: predicated region fallthrough
CT: control target
= control target key end

     0   :  { %9 = vsyncpa [#allocation3], 0  ;;  %s623_s15 = smov [#allocation2]   ;;  %s710_s0 = inlined_call_operand.vmem [shape: f32[8,16], index: 0, kind: input, shape index: {}]   ;;  %s711_s1 = inlined_call_operand.vmem [shape: bf16[16,128], index: 1, kind: input, shape index: {}]   ;;  %s712_s2 = inlined_call_operand.hbm [shape: bf16[3,128,128], index: 2, kind: input, shape index: {}]   ;;  %s713_s3 = inlined_call_operand.vmem [shape: f32[4,1,128], index: 3, kind: input, shape index: {}]   ;;  %s714_s4 = inlined_call_operand.vmem [shape: f32[8,128], index: 4, kind: output, shape index: {}]  }
   0x1   :  { %s19_s16 = sshll.u32 %s623_s15, 4  ;;  %s20_s16 = int_to_ptr.vmem [resolvable:$true] %s19_s16 }
   0x2   :  { %s609_s17 = scalar_lea.vmem %s20_s16, 3072  ;;  %p614_p1 = scmp.lt.s32.totalorder %s20_s16, %s20_s16 }
   0x3   :  { %p610_p0 = scmp.ne.s32.totalorder %s20_s16, %s609_s17  ;;  %p615_p2 = scmp.lt.s32.totalorder %s609_s17, %s609_s17 }
   0x5   :  { %p616_p3 = por %p615_p2, %p614_p1 }
   0x7   :  { %p617_p4 = pnand %p616_p3, %p610_p0 }
   0x9   :  { %620 = shalt.err (!%p617_p4)
}
   0xa   :  { %s624_s18 = smov 64   ;;  %s625_s19 = smov 4  }
   0xb   :  { %25 = dma.hbm_to_vmem [thread:$0]  %s712_s2, 3072, %s20_s16, [#allocation3], %s624_s18, %s624_s18, %s625_s19  }
   0xc   :  { %621 = dma.done.wait [#allocation3], 3072  }
   0xd   :  { %622 = vsyncadd [#allocation3], 4294964224  ;;  %v626_v0 = vmov 0.0   ;;  %vm627_vm0 = vmmov 0   ;;  %v576_v1 = vld [vmem:[%s711_s1] sm:$0xff]   ;;  %vm49_vm1 = vcmask 130048  }
   0xe   :  { %505 = vmatprep.subr.bf16.mxu0 %v626_v0  ;;  %507 = vmatprep.mubr.msk.bf16.mxu0 %vm627_vm0, %v626_v0  ;;  %v32_v2 = vld [vmem:[%s710_s0] sm:$0xff]  ;;  %v577_v4 = vld [vmem:[#allocation2 + $0x38] sm:$0xff]   ;;  %v578_v5 = vld [vmem:[#allocation2 + $0x30] sm:$0xff]  }
   0xf   :  { %511 = vmatprep.subr.bf16.mxu1 %v626_v0  ;;  %527 = vmatprep.mubr.msk.bf16.mxu1 %vm627_vm0, %v626_v0  ;;  %v33_v3 = vpack.c.bf16 %v32_v2, %v32_v2  ;;  %v579_v6 = vld [vmem:[#allocation2 + $0x28] sm:$0xff]   ;;  %v580_v7 = vld [vmem:[#allocation2 + $0x20] sm:$0xff]   ;;  %v581_v8 = vld [vmem:[#allocation2 + $0x18] sm:$0xff]  }
  0x10   :  { %506 = vmatpush3.bf16.msra.mxu0 %v576_v1  ;;  %512 = vmatpush3.bf16.msra.mxu1 %v577_v4  ;;  %v582_v9 = vld [vmem:[#allocation2 + $0x10] sm:$0xff]   ;;  %v583_v10 = vld [vmem:[#allocation2 + $0x8] sm:$0xff]   ;;  %v584_v11 = vld [vmem:[#allocation2] sm:$0xff]  }
  0x11   :  { %531 = vmatprep.subr.bf16.mxu0 %v626_v0  ;;  %513 = vmatprep.subr.bf16.mxu1 %v626_v0  ;;  %v585_v12 = vld [vmem:[#allocation2 + $0x78] sm:$0xff]   ;;  %v586_v13 = vld [vmem:[#allocation2 + $0x70] sm:$0xff]   ;;  %v587_v14 = vld [vmem:[#allocation2 + $0x68] sm:$0xff]  }
  0x12   :  { %v588_v15 = vld [vmem:[#allocation2 + $0x60] sm:$0xff]   ;;  %v589_v16 = vld [vmem:[#allocation2 + $0x58] sm:$0xff]   ;;  %v590_v17 = vld [vmem:[#allocation2 + $0x50] sm:$0xff]  }
  0x13   :  { %508 = vmatmul.mubr.msk.bf16.vlgmr.msra.gmra.mxu0 %vm49_vm1, %v33_v3  ;;  %v443_v18 = vld [vmem:[%s713_s3] ss:$0 sm:$0xff]  ;;  %v591_v26 = vld [vmem:[#allocation2 + $0x48] sm:$0xff]   ;;  %v593_v28 = vld [vmem:[#allocation2 + $0xb8] sm:$0xff]  }
  0x14   :  { %547 = vmatprep.mubr.msk.bf16.mxu0 %vm627_vm0, %v626_v0  ;;  %514 = vmatpush3.bf16.msra.mxu1 %v578_v5  ;;  %v592_v27 = vld [vmem:[#allocation2 + $0x40] sm:$0xff]   ;;  %v594_v29 = vld [vmem:[#allocation2 + $0xb0] sm:$0xff]   ;;  %v595_v30 = vld [vmem:[#allocation2 + $0xa8] sm:$0xff]  }
  0x15   :  { %515 = vmatprep.subr.bf16.mxu1 %v626_v0  ;;  %532 = vmatpush3.bf16.msra.mxu0 %v585_v12  ;;  %v596_v31 = vld [vmem:[#allocation2 + $0xa0] sm:$0xff]   ;;  %v597_v32 = vld [vmem:[#allocation2 + $0x98] sm:$0xff]   ;;  %v598_v33 = vld [vmem:[#allocation2 + $0x90] sm:$0xff]  }
  0x16   :  { %533 = vmatprep.subr.bf16.mxu0 %v626_v0  ;;  %v447_v34 = vld [vmem:[%s713_s3 + $0x1] ss:$0 sm:$0xff]  ;;  %v599_v42 = vld [vmem:[#allocation2 + $0x88] sm:$0xff]   ;;  %v457_v44 = vld [vmem:[%s713_s3 + $0x2] ss:$0 sm:$0xff] }
  0x17   :  { %v600_v43 = vld [vmem:[#allocation2 + $0x80] sm:$0xff]  }
  0x18   :  { %516 = vmatpush3.bf16.msra.mxu1 %v579_v6  ;;  %v467_v52 = vld [vmem:[%s713_s3 + $0x3] ss:$0 sm:$0xff] }
  0x19   :  { %517 = vmatprep.subr.bf16.mxu1 %v626_v0  ;;  %534 = vmatpush3.bf16.msra.mxu0 %v586_v13 }
  0x1a   :  { %535 = vmatprep.subr.bf16.mxu0 %v626_v0 }
  0x1c   :  { %518 = vmatpush3.bf16.msra.mxu1 %v580_v7 }
  0x1d   :  { %519 = vmatprep.subr.bf16.mxu1 %v626_v0  ;;  %536 = vmatpush3.bf16.msra.mxu0 %v587_v14 }
  0x1e   :  { %537 = vmatprep.subr.bf16.mxu0 %v626_v0 }
  0x20   :  { %520 = vmatpush3.bf16.msra.mxu1 %v581_v8 }
  0x21   :  { %521 = vmatprep.subr.bf16.mxu1 %v626_v0  ;;  %538 = vmatpush3.bf16.msra.mxu0 %v588_v15 }
  0x22   :  { %539 = vmatprep.subr.bf16.mxu0 %v626_v0 }
  0x24   :  { %522 = vmatpush3.bf16.msra.mxu1 %v582_v9 }
  0x25   :  { %523 = vmatprep.subr.bf16.mxu1 %v626_v0  ;;  %540 = vmatpush3.bf16.msra.mxu0 %v589_v16 }
  0x26   :  { %541 = vmatprep.subr.bf16.mxu0 %v626_v0 }
  0x28   :  { %524 = vmatpush3.bf16.msra.mxu1 %v583_v10 }
  0x29   :  { %525 = vmatprep.subr.bf16.mxu1 %v626_v0  ;;  %542 = vmatpush3.bf16.msra.mxu0 %v590_v17 }
  0x2a   :  { %543 = vmatprep.subr.bf16.mxu0 %v626_v0 }
  0x2c   :  { %526 = vmatpush3.bf16.msra.mxu1 %v584_v11 }
  0x2d   :  { %551 = vmatprep.subr.bf16.mxu1 %v626_v0  ;;  %544 = vmatpush3.bf16.msra.mxu0 %v591_v26 }
  0x2e   :  { %545 = vmatprep.subr.bf16.mxu0 %v626_v0 }
  0x31   :  { %546 = vmatpush3.bf16.msra.mxu0 %v592_v27 }
  0xd3   :  { %v87_v19 = vpop.f32.mrf.mxu0 }
  0xd4   :  { %v88_v20 = vadd.f32 %v443_v18, %v87_v19 }
  0xd5   :  { %v509_v21 = vpop.f32.mrf.mxu0 }
  0xd6   :  { %v93_v22 = vmax.f32 %v88_v20, 0.0 }
  0xd7   :  { %v90_v23 = vpop.f32.mrf.mxu0 }
  0xd8   :  { %v94_v24 = vpack.c.bf16 %v93_v22, %v93_v22 }
  0xd9   :  { %v510_v25 = vpop.f32.mrf.mxu0 }
  0xda   :  { %528 = vmatmul.mubr.bf16.vlgmr.msra.gmra.mxu1 %v94_v24 }
  0xdb   :  { %567 = vmatprep.mubr.msk.bf16.mxu1 %vm627_vm0, %v626_v0  ;;  %552 = vmatpush3.bf16.msra.mxu1 %v593_v28 }
  0xdc   :  { %553 = vmatprep.subr.bf16.mxu1 %v626_v0 }
  0xdf   :  { %554 = vmatpush3.bf16.msra.mxu1 %v594_v29 }
  0xe0   :  { %555 = vmatprep.subr.bf16.mxu1 %v626_v0 }
  0xe3   :  { %556 = vmatpush3.bf16.msra.mxu1 %v595_v30 }
  0xe4   :  { %557 = vmatprep.subr.bf16.mxu1 %v626_v0 }
  0xe7   :  { %558 = vmatpush3.bf16.msra.mxu1 %v596_v31 }
  0xe8   :  { %559 = vmatprep.subr.bf16.mxu1 %v626_v0 }
  0xeb   :  { %560 = vmatpush3.bf16.msra.mxu1 %v597_v32 }
  0xec   :  { %561 = vmatprep.subr.bf16.mxu1 %v626_v0 }
  0xef   :  { %562 = vmatpush3.bf16.msra.mxu1 %v598_v33 }
  0xf0   :  { %563 = vmatprep.subr.bf16.mxu1 %v626_v0 }
  0xf3   :  { %564 = vmatpush3.bf16.msra.mxu1 %v599_v42 }
  0xf4   :  { %565 = vmatprep.subr.bf16.mxu1 %v626_v0 }
  0xf7   :  { %566 = vmatpush3.bf16.msra.mxu1 %v600_v43 }
 0x19a   :  { %v201_v35 = vpop.f32.mrf.mxu1 }
 0x19b   :  { %v202_v36 = vadd.f32 %v447_v34, %v201_v35 }
 0x19c   :  { %v529_v37 = vpop.f32.mrf.mxu1 }
 0x19d   :  { %v207_v38 = vmax.f32 %v202_v36, 0.0 }
 0x19e   :  { %v204_v39 = vpop.f32.mrf.mxu1 }
 0x19f   :  { %v208_v40 = vpack.c.bf16 %v207_v38, %v207_v38 }
 0x1a0   :  { %v530_v41 = vpop.f32.mrf.mxu1 }
 0x1a1   :  { %548 = vmatmul.mubr.bf16.vlgmr.msra.gmra.mxu0 %v208_v40 }
 0x261   :  { %v316_v45 = vpop.f32.mrf.mxu0 }
 0x262   :  { %v317_v46 = vadd.f32 %v457_v44, %v316_v45 }
 0x263   :  { %v549_v47 = vpop.f32.mrf.mxu0 }
 0x264   :  { %v322_v48 = vmax.f32 %v317_v46, 0.0 }
 0x265   :  { %v319_v49 = vpop.f32.mrf.mxu0 }
 0x266   :  { %v323_v50 = vpack.c.bf16 %v322_v48, %v322_v48 }
 0x267   :  { %v550_v51 = vpop.f32.mrf.mxu0 }
 0x268   :  { %568 = vmatmul.mubr.bf16.vlgmr.msra.gmra.mxu1 %v323_v50 }
 0x328   :  { %v431_v53 = vpop.f32.mrf.mxu1 }
 0x329   :  { %v432_v54 = vadd.f32 %v467_v52, %v431_v53 }
 0x32a   :  { %v569_v55 = vpop.f32.mrf.mxu1 }
 0x32b   :  { %437 = vst [vmem:[%s714_s4] sm:$0xff] %v432_v54 }
 0x32c   :  { %v434_v56 = vpop.f32.mrf.mxu1 }
 0x32e   :  { %v570_v57 = vpop.f32.mrf.mxu1 }
 0x32f   :  { %442 = vsyncpa [#allocation3], 1 }

</bundles_post_ra>
